<compile_context>
chip_gen: v7x
topology: tpu7x:2x2x1
jax: 0.10.0
libtpu: 0.0.40
codegen_flags: <defaults>
</compile_context>

<pallas_src>
import jax
import jax.numpy as jnp
import numpy as np
from jax.experimental import pallas as pl
from jax.experimental.pallas import tpu as pltpu

EPS = 1e-5

# Fast-path knobs requested by the perf review.  Set USE_BF16_MATMUL=False and
# INTERMEDIATE_DTYPE=jnp.float32 to recover a near-exact f32 path (1e-3 tol).
USE_BF16_MATMUL = True               # bf16 MXU operands, f32 accumulation
INTERMEDIATE_DTYPE = jnp.bfloat16    # HBM dtype of the conv1/conv2 intermediates


# ---------------------------------------------------------------------------
# In-kernel helpers
# ---------------------------------------------------------------------------
def _conv3x3_banded(x, w_ref):
    """3x3 'same' conv of a (Bt, H, W*Cin) tile via 3 banded MXU matmuls.

    W and C are fused in the lane dim, so for each kernel row dy the conv is
    one matmul against a block-banded (W*Cin, W*Cout) matrix built in the
    wrapper:
        y[:, h, :] = x[:, h-1, :] @ Wb[0] + x[:, h, :] @ Wb[1] + x[:, h+1, :] @ Wb[2]
    Returns a (Bt*H, W*Cout) float32 accumulator.
    """
    Bt, H, WC = x.shape
    xc = x.astype(w_ref.dtype)                           # bf16 MXU operands
    zrow = jnp.zeros((Bt, 1, WC), xc.dtype)
    xp = jnp.concatenate([zrow, xc, zrow], axis=1)       # (Bt, H+2, WC)
    x_prev = xp[:, 0:H, :].reshape(Bt * H, WC)           # row h-1 (zero at h=0)
    x_curr = xc.reshape(Bt * H, WC)                      # row h
    x_next = xp[:, 2:H + 2, :].reshape(Bt * H, WC)       # row h+1 (zero at h=H-1)
    acc = jnp.dot(x_prev, w_ref[0], preferred_element_type=jnp.float32)
    acc = acc + jnp.dot(x_curr, w_ref[1], preferred_element_type=jnp.float32)
    acc = acc + jnp.dot(x_next, w_ref[2], preferred_element_type=jnp.float32)
    return acc


def _write_stats(stats_ref, acc):
    """Per-tile (sum, sum-of-squares) over rows; lane-dense (2, W*C) store."""
    s = jnp.sum(acc, axis=0, keepdims=True)              # (1, W*C) f32
    sq = jnp.sum(acc * acc, axis=0, keepdims=True)       # (1, W*C) f32
    stats_ref[0] = jnp.concatenate([s, sq], axis=0)      # cheap sublane concat


# ---------------------------------------------------------------------------
# Kernels (one batch-chunk of shape (Bt, H, W*C) per grid step)
# ---------------------------------------------------------------------------
def _conv1_stats_kernel(x_ref, w_ref, y_ref, stats_ref):
    # x_ref: (Bt,H,WC) f32  w_ref: (3,WC,WC)  y_ref: (Bt,H,WC)  stats: (1,2,WC)
    Bt, H, WC = y_ref.shape
    acc = _conv3x3_banded(x_ref[...], w_ref)             # (Bt*H, WC) f32
    y_ref[...] = acc.astype(y_ref.dtype).reshape(Bt, H, WC)
    _write_stats(stats_ref, acc)                         # stats from f32 acc


def _bn_relu_conv2_stats_kernel(c1_ref, sc_ref, sh_ref, w_ref, y_ref, stats_ref):
    # c1_ref: raw conv1 (bf16); sc/sh: fused BN1 scale/shift, (1, WC) f32.
    Bt, H, WC = y_ref.shape
    scale = sc_ref[...].reshape(1, 1, WC)
    shift = sh_ref[...].reshape(1, 1, WC)
    a = jnp.maximum(c1_ref[...].astype(jnp.float32) * scale + shift, 0.0)
    acc = _conv3x3_banded(a, w_ref)                      # conv2
    y_ref[...] = acc.astype(y_ref.dtype).reshape(Bt, H, WC)
    _write_stats(stats_ref, acc)


def _bn_add_relu_kernel(c2_ref, sc_ref, sh_ref, x_ref, o_ref):
    # c2_ref: raw conv2 (bf16); x_ref: residual (f32); o_ref aliases x's HBM.
    WC = o_ref.shape[-1]
    scale = sc_ref[...].reshape(1, 1, WC)
    shift = sh_ref[...].reshape(1, 1, WC)
    y = c2_ref[...].astype(jnp.float32) * scale + shift + x_ref[...]
    o_ref[...] = jnp.maximum(y, 0.0)


# ---------------------------------------------------------------------------
# Wrapper-side helpers (tiny, trace-time / XLA epilogue work)
# ---------------------------------------------------------------------------
def _banded_weights(w_hwio, W):
    """(3,3,Cin,Cout) HWIO -> (3, W*Cin, W*Cout) block-banded matrices.

    band[dy, wi*Cin+ci, wo*Cout+co] = w[dy, wi-wo+1, ci, co] if |wi-wo|<=1 else 0,
    which also implements the left/right 'same' zero padding for free.
    """
    KH, KW, Cin, Cout = w_hwio.shape
    wi = jnp.arange(W)[:, None]                    # input  column (matmul rows)
    wo = jnp.arange(W)[None, :]                    # output column (matmul cols)
    dx = wi - wo + 1                               # tap index, valid iff 0<=dx<KW
    valid = (dx >= 0) & (dx < KW)
    band = w_hwio[:, jnp.clip(dx, 0, KW - 1), :, :]        # (3, W, W, Cin, Cout)
    band = jnp.where(valid[None, :, :, None, None], band, 0.0)
    band = jnp.transpose(band, (0, 1, 3, 2, 4))            # (3, W, Cin, W, Cout)
    return band.reshape(KH, W * Cin, W * Cout)


def _finalize_bn(partial_stats, gamma, beta, n, W, C):
    """Reduce per-tile (sum, sumsq) -> fused per-lane scale/shift (1, W*C)."""
    s = jnp.sum(partial_stats, axis=0).reshape(2, W, C).sum(axis=1)    # (2, C)
    mean = s[0] / n
    # One-pass variance; clamp >= 0 to avoid NaN from cancellation (review).
    var = jnp.maximum(s[1] / n - mean * mean, 0.0)
    scale_c = gamma.astype(jnp.float32) * jax.lax.rsqrt(var + EPS)
    shift_c = beta.astype(jnp.float32) - mean * scale_c
    # Expand per-channel vectors to the fused (w, c) lane layout.
    return (jnp.tile(scale_c, W).reshape(1, W * C),
            jnp.tile(shift_c, W).reshape(1, W * C))


def _vmem_limit_bytes():
    try:
        cap = pltpu.get_tpu_info().vmem_capacity_bytes
    except Exception:
        cap = 64 << 20                       # conservative fallback (v7x-sized)
    # ~3/4 of physical, capped at 100 MiB: ~96 MiB on v5e/v6e, 48 MiB on v7x.
    return int(min(100 << 20, cap * 3 // 4))


def _pick_batch_tile(B, H, WC):
    """Largest divisor of B with <= ~8 MiB of f32 activations per grid step,
    keeping >= 2 grid steps when possible (pipelining / megacore)."""
    tile_bytes = H * WC * 4
    target = 8 << 20
    bt = 1
    for d in range(1, B + 1):
        if B % d == 0 and d * tile_bytes <= target and (B // d) >= min(2, B):
            bt = d
    return bt


# ---------------------------------------------------------------------------
# Forward pass
# ---------------------------------------------------------------------------
@jax.jit
def block_forward(x_nchw, w1, g1, b1, w2, g2, b2):
    """Forward of Block. x_nchw: (B,C,H,W) f32; w1/w2: (3,3,Cin,Cout) HWIO."""
    B, C, H, W = x_nchw.shape
    assert w1.shape == (3, 3, C, C) and w2.shape == (3, 3, C, C), (
        "Block defaults assumed: in_planes == planes, stride=1, no downsample")
    WC = W * C

    # Lane-dense layout: NHWC with W and C fused into the last (lane) dim.
    x = jnp.transpose(x_nchw, (0, 2, 3, 1)).astype(jnp.float32).reshape(B, H, WC)

    cdt = jnp.bfloat16 if USE_BF16_MATMUL else jnp.float32
    w1b = _banded_weights(w1.astype(jnp.float32), W).astype(cdt)   # (3, WC, WC)
    w2b = _banded_weights(w2.astype(jnp.float32), W).astype(cdt)

    n = float(B * H * W)
    bt = _pick_batch_tile(B, H, WC)
    nb = B // bt
    idt = INTERMEDIATE_DTYPE

    cparams = pltpu.CompilerParams(
        dimension_semantics=("parallel",),           # batch tiles -> both TCs
        vmem_limit_bytes=_vmem_limit_bytes())

    dspec = pl.BlockSpec((bt, H, WC), lambda i: (i, 0, 0))   # lane-dense data
    wspec = pl.BlockSpec((3, WC, WC), lambda i: (0, 0, 0))   # resident weights
    vspec = pl.BlockSpec((1, WC), lambda i: (0, 0))          # scale/shift rows
    sspec = pl.BlockSpec((1, 2, WC), lambda i: (i, 0, 0))    # per-tile stats

    # ---- pass 1: conv1 + per-tile stats ------------------------------------
    c1, st1 = pl.pallas_call(
        _conv1_stats_kernel,
        out_shape=(jax.ShapeDtypeStruct((B, H, WC), idt),
                   jax.ShapeDtypeStruct((nb, 2, WC), jnp.float32)),
        grid=(nb,),
        in_specs=[dspec, wspec],
        out_specs=(dspec, sspec),
        compiler_params=cparams,
    )(x, w1b)
    scale1, shift1 = _finalize_bn(st1, g1, b1, n, W, C)

    # ---- pass 2: bn1 + relu + conv2 + per-tile stats -----------------------
    c2, st2 = pl.pallas_call(
        _bn_relu_conv2_stats_kernel,
        out_shape=(jax.ShapeDtypeStruct((B, H, WC), idt),
                   jax.ShapeDtypeStruct((nb, 2, WC), jnp.float32)),
        grid=(nb,),
        in_specs=[dspec, vspec, vspec, wspec],
        out_specs=(dspec, sspec),
        compiler_params=cparams,
    )(c1, scale1, shift1, w2b)
    scale2, shift2 = _finalize_bn(st2, g2, b2, n, W, C)

    # ---- pass 3: bn2 + residual + relu (output aliases x's buffer) ---------
    out = pl.pallas_call(
        _bn_add_relu_kernel,
        out_shape=jax.ShapeDtypeStruct((B, H, WC), jnp.float32),
        grid=(nb,),
        in_specs=[dspec, vspec, vspec, dspec],
        out_specs=dspec,
        input_output_aliases={3: 0},
        compiler_params=cparams,
    )(c2, scale2, shift2, x)

    return jnp.transpose(out.reshape(B, H, W, C), (0, 3, 1, 2))      # NCHW


# ---------------------------------------------------------------------------
# Pure-JAX reference (mirrors the PyTorch Block in training-mode BN)
# ---------------------------------------------------------------------------
@jax.jit
def _reference(x_nchw, w1, g1, b1, w2, g2, b2):
    x = jnp.transpose(x_nchw, (0, 2, 3, 1))

    def conv(inp, w):
        return jax.lax.conv_general_dilated(
            inp, w, window_strides=(1, 1), padding="SAME",
            dimension_numbers=("NHWC", "HWIO", "NHWC"))

    def bn(inp, g, b):
        m = jnp.mean(inp, axis=(0, 1, 2), keepdims=True)
        v = jnp.mean((inp - m) ** 2, axis=(0, 1, 2), keepdims=True)
        return ((inp - m) * jax.lax.rsqrt(v + EPS) * g.reshape(1, 1, 1, -1)
                + b.reshape(1, 1, 1, -1))

    y = jax.nn.relu(bn(conv(x, w1), g1, b1))
    y = bn(conv(y, w2), g2, b2)
    y = jax.nn.relu(y + x)
    return jnp.transpose(y, (0, 3, 1, 2))


if __name__ == "__main__":
    key = jax.random.PRNGKey(0)
    B, C, H, W = 2, 8, 16, 16           # in_planes == planes; W*C = 128 lanes

    k = jax.random.split(key, 7)
    x = jax.random.normal(k[0], (B, C, H, W), dtype=jnp.float32)
    fan_in = 3 * 3 * C
    w1 = jax.random.normal(k[1], (3, 3, C, C), dtype=jnp.float32) / np.sqrt(fan_in)
    w2 = jax.random.normal(k[2], (3, 3, C, C), dtype=jnp.float32) / np.sqrt(fan_in)
    g1 = 1.0 + 0.1 * jax.random.normal(k[3], (C,), dtype=jnp.float32)
    b1 = 0.1 * jax.random.normal(k[4], (C,), dtype=jnp.float32)
    g2 = 1.0 + 0.1 * jax.random.normal(k[5], (C,), dtype=jnp.float32)
    b2 = 0.1 * jax.random.normal(k[6], (C,), dtype=jnp.float32)

    out = jax.block_until_ready(block_forward(x, w1, g1, b1, w2, g2, b2))
    ref = jax.block_until_ready(_reference(x, w1, g1, b1, w2, g2, b2))

    # bf16 intermediate storage + bf16 MXU operands bound the error well under
    # 5e-2; the pure-f32 path (flags off) matches to 1e-3.
    lossy = USE_BF16_MATMUL or (INTERMEDIATE_DTYPE != jnp.float32)
    tol = 5e-2 if lossy else 1e-3
    np.testing.assert_allclose(np.asarray(out), np.asarray(ref),
                               rtol=tol, atol=tol)

    print("KERNEL_OK")
</pallas_src>

<mosaic_0001>
module attributes {stable_mosaic.version = 11 : i64} {
  func.func @_conv1_stats_kernel(%arg0: i32, %arg1: memref<1x16x128xf32, #tpu.memory_space<vmem>>, %arg2: memref<3x128x128xbf16, #tpu.memory_space<vmem>>, %arg3: memref<1x16x128xbf16, #tpu.memory_space<vmem>>, %arg4: memref<1x2x128xf32, #tpu.memory_space<vmem>>) attributes {dimension_semantics = [#tpu.dimension_semantics<parallel>], iteration_bounds = array<i64: 2>, scalar_prefetch = 0 : i64, scratch_operands = 0 : i64, tpu.core_type = #tpu.core_type<tc>, window_params = [{transform_indices = @transform_0, window_bounds = array<i64: 1, 16, 128>}, {pipeline_mode = #tpu.pipeline_mode<synchronous>, transform_indices = @transform_1, window_bounds = array<i64: 3, 128, 128>}, {transform_indices = @transform_2, window_bounds = array<i64: 1, 16, 128>}, {transform_indices = @transform_3, window_bounds = array<i64: 1, 2, 128>}]} {
    %c0 = arith.constant 0 : index
    %c0_0 = arith.constant 0 : index
    %c0_1 = arith.constant 0 : index
    %0 = vector.load %arg1[%c0, %c0_0, %c0_1] : memref<1x16x128xf32, #tpu.memory_space<vmem>>, vector<1x16x128xf32>
    %1 = arith.truncf %0 : vector<1x16x128xf32> to vector<1x16x128xbf16>
    %cst = arith.constant 0.000000e+00 : bf16
    %2 = vector.broadcast %cst : bf16 to vector<1x1x128xbf16>
    %3 = tpu.concatenate %2, %1, %2 in 1 : vector<1x1x128xbf16>, vector<1x16x128xbf16>, vector<1x1x128xbf16> -> vector<1x18x128xbf16>
    %4 = vector.extract_strided_slice %3 {offsets = [0, 0, 0], sizes = [1, 16, 128], strides = [1, 1, 1]} : vector<1x18x128xbf16> to vector<1x16x128xbf16>
    %5 = vector.shape_cast %4 : vector<1x16x128xbf16> to vector<16x128xbf16>
    %6 = vector.shape_cast %1 : vector<1x16x128xbf16> to vector<16x128xbf16>
    %7 = vector.extract_strided_slice %3 {offsets = [0, 2, 0], sizes = [1, 16, 128], strides = [1, 1, 1]} : vector<1x18x128xbf16> to vector<1x16x128xbf16>
    %8 = vector.shape_cast %7 : vector<1x16x128xbf16> to vector<16x128xbf16>
    %c0_2 = arith.constant 0 : index
    %c0_3 = arith.constant 0 : index
    %c0_4 = arith.constant 0 : index
    %9 = vector.load %arg2[%c0_2, %c0_3, %c0_4] : memref<3x128x128xbf16, #tpu.memory_space<vmem>>, vector<1x128x128xbf16>
    %10 = vector.shape_cast %9 : vector<1x128x128xbf16> to vector<128x128xbf16>
    %cst_5 = arith.constant dense<0.000000e+00> : vector<16x128xf32>
    %11 = tpu.matmul %5, %10, %cst_5 {dimension_numbers = #tpu.dot_dimension_numbers<[1], [0], [0], [1], [0, 0, 1, 1], [], []>} : vector<16x128xbf16>, vector<128x128xbf16>, vector<16x128xf32> -> vector<16x128xf32>
    %c1 = arith.constant 1 : index
    %c0_6 = arith.constant 0 : index
    %c0_7 = arith.constant 0 : index
    %12 = vector.load %arg2[%c1, %c0_6, %c0_7] : memref<3x128x128xbf16, #tpu.memory_space<vmem>>, vector<1x128x128xbf16>
    %13 = vector.shape_cast %12 : vector<1x128x128xbf16> to vector<128x128xbf16>
    %cst_8 = arith.constant dense<0.000000e+00> : vector<16x128xf32>
    %14 = tpu.matmul %6, %13, %cst_8 {dimension_numbers = #tpu.dot_dimension_numbers<[1], [0], [0], [1], [0, 0, 1, 1], [], []>} : vector<16x128xbf16>, vector<128x128xbf16>, vector<16x128xf32> -> vector<16x128xf32>
    %15 = arith.addf %11, %14 : vector<16x128xf32>
    %c2 = arith.constant 2 : index
    %c0_9 = arith.constant 0 : index
    %c0_10 = arith.constant 0 : index
    %16 = vector.load %arg2[%c2, %c0_9, %c0_10] : memref<3x128x128xbf16, #tpu.memory_space<vmem>>, vector<1x128x128xbf16>
    %17 = vector.shape_cast %16 : vector<1x128x128xbf16> to vector<128x128xbf16>
    %cst_11 = arith.constant dense<0.000000e+00> : vector<16x128xf32>
    %18 = tpu.matmul %8, %17, %cst_11 {dimension_numbers = #tpu.dot_dimension_numbers<[1], [0], [0], [1], [0, 0, 1, 1], [], []>} : vector<16x128xbf16>, vector<128x128xbf16>, vector<16x128xf32> -> vector<16x128xf32>
    %19 = arith.addf %15, %18 : vector<16x128xf32>
    %20 = arith.truncf %19 : vector<16x128xf32> to vector<16x128xbf16>
    %21 = vector.shape_cast %20 : vector<16x128xbf16> to vector<1x16x128xbf16>
    %c0_12 = arith.constant 0 : index
    %c0_13 = arith.constant 0 : index
    %c0_14 = arith.constant 0 : index
    %22 = vector.load %arg3[%c0_12, %c0_13, %c0_14] : memref<1x16x128xbf16, #tpu.memory_space<vmem>>, vector<1x16x128xbf16>
    tpu.vector_store %arg3[%c0_12, %c0_13, %c0_14], %21 {strides = array<i32>} : memref<1x16x128xbf16, #tpu.memory_space<vmem>>, vector<1x16x128xbf16>,
    %cst_15 = arith.constant dense<0.000000e+00> : vector<128xf32>
    %23 = vector.multi_reduction <add>, %19, %cst_15 [0] : vector<16x128xf32> to vector<128xf32>
    %24 = vector.shape_cast %23 : vector<128xf32> to vector<1x128xf32>
    %25 = arith.mulf %19, %19 : vector<16x128xf32>
    %cst_16 = arith.constant dense<0.000000e+00> : vector<128xf32>
    %26 = vector.multi_reduction <add>, %25, %cst_16 [0] : vector<16x128xf32> to vector<128xf32>
    %27 = vector.shape_cast %26 : vector<128xf32> to vector<1x128xf32>
    %28 = tpu.concatenate %24, %27 in 0 : vector<1x128xf32>, vector<1x128xf32> -> vector<2x128xf32>
    %c0_17 = arith.constant 0 : index
    %c0_18 = arith.constant 0 : index
    %c0_19 = arith.constant 0 : index
    %29 = vector.load %arg4[%c0_17, %c0_18, %c0_19] : memref<1x2x128xf32, #tpu.memory_space<vmem>>, vector<1x2x128xf32>
    %30 = vector.shape_cast %29 : vector<1x2x128xf32> to vector<2x128xf32>
    %31 = vector.shape_cast %28 : vector<2x128xf32> to vector<1x2x128xf32>
    tpu.vector_store %arg4[%c0_17, %c0_18, %c0_19], %31 {strides = array<i32>} : memref<1x2x128xf32, #tpu.memory_space<vmem>>, vector<1x2x128xf32>,
    return
  }
  func.func @transform_0(%arg0: i32) -> (i32, i32, i32) {
    %c0_i32 = arith.constant 0 : i32
    %c0_i32_0 = arith.constant 0 : i32
    %c0_i32_1 = arith.constant 0 : i32
    return %arg0, %c0_i32, %c0_i32_0 : i32, i32, i32
  }
  func.func @transform_1(%arg0: i32) -> (i32, i32, i32) {
    %c0_i32 = arith.constant 0 : i32
    %c0_i32_0 = arith.constant 0 : i32
    %c0_i32_1 = arith.constant 0 : i32
    %c0_i32_2 = arith.constant 0 : i32
    return %c0_i32, %c0_i32_0, %c0_i32_1 : i32, i32, i32
  }
  func.func @transform_2(%arg0: i32) -> (i32, i32, i32) {
    %c0_i32 = arith.constant 0 : i32
    %c0_i32_0 = arith.constant 0 : i32
    %c0_i32_1 = arith.constant 0 : i32
    return %arg0, %c0_i32, %c0_i32_0 : i32, i32, i32
  }
  func.func @transform_3(%arg0: i32) -> (i32, i32, i32) {
    %c0_i32 = arith.constant 0 : i32
    %c0_i32_0 = arith.constant 0 : i32
    %c0_i32_1 = arith.constant 0 : i32
    return %arg0, %c0_i32, %c0_i32_0 : i32, i32, i32
  }
}

module attributes {stable_mosaic.version = 11 : i64} {
  func.func @_bn_relu_conv2_stats_kernel(%arg0: i32, %arg1: memref<1x16x128xbf16, #tpu.memory_space<vmem>>, %arg2: memref<1x128xf32, #tpu.memory_space<vmem>>, %arg3: memref<1x128xf32, #tpu.memory_space<vmem>>, %arg4: memref<3x128x128xbf16, #tpu.memory_space<vmem>>, %arg5: memref<1x16x128xbf16, #tpu.memory_space<vmem>>, %arg6: memref<1x2x128xf32, #tpu.memory_space<vmem>>) attributes {dimension_semantics = [#tpu.dimension_semantics<parallel>], iteration_bounds = array<i64: 2>, scalar_prefetch = 0 : i64, scratch_operands = 0 : i64, tpu.core_type = #tpu.core_type<tc>, window_params = [{transform_indices = @transform_0, window_bounds = array<i64: 1, 16, 128>}, {pipeline_mode = #tpu.pipeline_mode<synchronous>, transform_indices = @transform_1, window_bounds = array<i64: 1, 128>}, {pipeline_mode = #tpu.pipeline_mode<synchronous>, transform_indices = @transform_2, window_bounds = array<i64: 1, 128>}, {pipeline_mode = #tpu.pipeline_mode<synchronous>, transform_indices = @transform_3, window_bounds = array<i64: 3, 128, 128>}, {transform_indices = @transform_4, window_bounds = array<i64: 1, 16, 128>}, {transform_indices = @transform_5, window_bounds = array<i64: 1, 2, 128>}]} {
    %c0 = arith.constant 0 : index
    %c0_0 = arith.constant 0 : index
    %0 = vector.load %arg2[%c0, %c0_0] : memref<1x128xf32, #tpu.memory_space<vmem>>, vector<1x128xf32>
    %1 = vector.shape_cast %0 : vector<1x128xf32> to vector<1x1x128xf32>
    %c0_1 = arith.constant 0 : index
    %c0_2 = arith.constant 0 : index
    %2 = vector.load %arg3[%c0_1, %c0_2] : memref<1x128xf32, #tpu.memory_space<vmem>>, vector<1x128xf32>
    %3 = vector.shape_cast %2 : vector<1x128xf32> to vector<1x1x128xf32>
    %c0_3 = arith.constant 0 : index
    %c0_4 = arith.constant 0 : index
    %c0_5 = arith.constant 0 : index
    %4 = vector.load %arg1[%c0_3, %c0_4, %c0_5] : memref<1x16x128xbf16, #tpu.memory_space<vmem>>, vector<1x16x128xbf16>
    %5 = arith.extf %4 : vector<1x16x128xbf16> to vector<1x16x128xf32>
    %6 = vector.broadcast %1 : vector<1x1x128xf32> to vector<1x16x128xf32>
    %7 = arith.mulf %5, %6 : vector<1x16x128xf32>
    %8 = vector.broadcast %3 : vector<1x1x128xf32> to vector<1x16x128xf32>
    %9 = arith.addf %7, %8 : vector<1x16x128xf32>
    %cst = arith.constant 0.000000e+00 : f32
    %10 = vector.broadcast %cst : f32 to vector<1x16x128xf32>
    %11 = arith.maximumf %9, %10 : vector<1x16x128xf32>
    %12 = arith.truncf %11 : vector<1x16x128xf32> to vector<1x16x128xbf16>
    %cst_6 = arith.constant 0.000000e+00 : bf16
    %13 = vector.broadcast %cst_6 : bf16 to vector<1x1x128xbf16>
    %14 = tpu.concatenate %13, %12, %13 in 1 : vector<1x1x128xbf16>, vector<1x16x128xbf16>, vector<1x1x128xbf16> -> vector<1x18x128xbf16>
    %15 = vector.extract_strided_slice %14 {offsets = [0, 0, 0], sizes = [1, 16, 128], strides = [1, 1, 1]} : vector<1x18x128xbf16> to vector<1x16x128xbf16>
    %16 = vector.shape_cast %15 : vector<1x16x128xbf16> to vector<16x128xbf16>
    %17 = vector.shape_cast %12 : vector<1x16x128xbf16> to vector<16x128xbf16>
    %18 = vector.extract_strided_slice %14 {offsets = [0, 2, 0], sizes = [1, 16, 128], strides = [1, 1, 1]} : vector<1x18x128xbf16> to vector<1x16x128xbf16>
    %19 = vector.shape_cast %18 : vector<1x16x128xbf16> to vector<16x128xbf16>
    %c0_7 = arith.constant 0 : index
    %c0_8 = arith.constant 0 : index
    %c0_9 = arith.constant 0 : index
    %20 = vector.load %arg4[%c0_7, %c0_8, %c0_9] : memref<3x128x128xbf16, #tpu.memory_space<vmem>>, vector<1x128x128xbf16>
    %21 = vector.shape_cast %20 : vector<1x128x128xbf16> to vector<128x128xbf16>
    %cst_10 = arith.constant dense<0.000000e+00> : vector<16x128xf32>
    %22 = tpu.matmul %16, %21, %cst_10 {dimension_numbers = #tpu.dot_dimension_numbers<[1], [0], [0], [1], [0, 0, 1, 1], [], []>} : vector<16x128xbf16>, vector<128x128xbf16>, vector<16x128xf32> -> vector<16x128xf32>
    %c1 = arith.constant 1 : index
    %c0_11 = arith.constant 0 : index
    %c0_12 = arith.constant 0 : index
    %23 = vector.load %arg4[%c1, %c0_11, %c0_12] : memref<3x128x128xbf16, #tpu.memory_space<vmem>>, vector<1x128x128xbf16>
    %24 = vector.shape_cast %23 : vector<1x128x128xbf16> to vector<128x128xbf16>
    %cst_13 = arith.constant dense<0.000000e+00> : vector<16x128xf32>
    %25 = tpu.matmul %17, %24, %cst_13 {dimension_numbers = #tpu.dot_dimension_numbers<[1], [0], [0], [1], [0, 0, 1, 1], [], []>} : vector<16x128xbf16>, vector<128x128xbf16>, vector<16x128xf32> -> vector<16x128xf32>
    %26 = arith.addf %22, %25 : vector<16x128xf32>
    %c2 = arith.constant 2 : index
    %c0_14 = arith.constant 0 : index
    %c0_15 = arith.constant 0 : index
    %27 = vector.load %arg4[%c2, %c0_14, %c0_15] : memref<3x128x128xbf16, #tpu.memory_space<vmem>>, vector<1x128x128xbf16>
    %28 = vector.shape_cast %27 : vector<1x128x128xbf16> to vector<128x128xbf16>
    %cst_16 = arith.constant dense<0.000000e+00> : vector<16x128xf32>
    %29 = tpu.matmul %19, %28, %cst_16 {dimension_numbers = #tpu.dot_dimension_numbers<[1], [0], [0], [1], [0, 0, 1, 1], [], []>} : vector<16x128xbf16>, vector<128x128xbf16>, vector<16x128xf32> -> vector<16x128xf32>
    %30 = arith.addf %26, %29 : vector<16x128xf32>
    %31 = arith.truncf %30 : vector<16x128xf32> to vector<16x128xbf16>
    %32 = vector.shape_cast %31 : vector<16x128xbf16> to vector<1x16x128xbf16>
    %c0_17 = arith.constant 0 : index
    %c0_18 = arith.constant 0 : index
    %c0_19 = arith.constant 0 : index
    %33 = vector.load %arg5[%c0_17, %c0_18, %c0_19] : memref<1x16x128xbf16, #tpu.memory_space<vmem>>, vector<1x16x128xbf16>
    tpu.vector_store %arg5[%c0_17, %c0_18, %c0_19], %32 {strides = array<i32>} : memref<1x16x128xbf16, #tpu.memory_space<vmem>>, vector<1x16x128xbf16>,
    %cst_20 = arith.constant dense<0.000000e+00> : vector<128xf32>
    %34 = vector.multi_reduction <add>, %30, %cst_20 [0] : vector<16x128xf32> to vector<128xf32>
    %35 = vector.shape_cast %34 : vector<128xf32> to vector<1x128xf32>
    %36 = arith.mulf %30, %30 : vector<16x128xf32>
    %cst_21 = arith.constant dense<0.000000e+00> : vector<128xf32>
    %37 = vector.multi_reduction <add>, %36, %cst_21 [0] : vector<16x128xf32> to vector<128xf32>
    %38 = vector.shape_cast %37 : vector<128xf32> to vector<1x128xf32>
    %39 = tpu.concatenate %35, %38 in 0 : vector<1x128xf32>, vector<1x128xf32> -> vector<2x128xf32>
    %c0_22 = arith.constant 0 : index
    %c0_23 = arith.constant 0 : index
    %c0_24 = arith.constant 0 : index
    %40 = vector.load %arg6[%c0_22, %c0_23, %c0_24] : memref<1x2x128xf32, #tpu.memory_space<vmem>>, vector<1x2x128xf32>
    %41 = vector.shape_cast %40 : vector<1x2x128xf32> to vector<2x128xf32>
    %42 = vector.shape_cast %39 : vector<2x128xf32> to vector<1x2x128xf32>
    tpu.vector_store %arg6[%c0_22, %c0_23, %c0_24], %42 {strides = array<i32>} : memref<1x2x128xf32, #tpu.memory_space<vmem>>, vector<1x2x128xf32>,
    return
  }
  func.func @transform_0(%arg0: i32) -> (i32, i32, i32) {
    %c0_i32 = arith.constant 0 : i32
    %c0_i32_0 = arith.constant 0 : i32
    %c0_i32_1 = arith.constant 0 : i32
    return %arg0, %c0_i32, %c0_i32_0 : i32, i32, i32
  }
  func.func @transform_1(%arg0: i32) -> (i32, i32) {
    %c0_i32 = arith.constant 0 : i32
    %c0_i32_0 = arith.constant 0 : i32
    %c0_i32_1 = arith.constant 0 : i32
    return %c0_i32, %c0_i32_0 : i32, i32
  }
  func.func @transform_2(%arg0: i32) -> (i32, i32) {
    %c0_i32 = arith.constant 0 : i32
    %c0_i32_0 = arith.constant 0 : i32
    %c0_i32_1 = arith.constant 0 : i32
    return %c0_i32, %c0_i32_0 : i32, i32
  }
  func.func @transform_3(%arg0: i32) -> (i32, i32, i32) {
    %c0_i32 = arith.constant 0 : i32
    %c0_i32_0 = arith.constant 0 : i32
    %c0_i32_1 = arith.constant 0 : i32
    %c0_i32_2 = arith.constant 0 : i32
    return %c0_i32, %c0_i32_0, %c0_i32_1 : i32, i32, i32
  }
  func.func @transform_4(%arg0: i32) -> (i32, i32, i32) {
    %c0_i32 = arith.constant 0 : i32
    %c0_i32_0 = arith.constant 0 : i32
    %c0_i32_1 = arith.constant 0 : i32
    return %arg0, %c0_i32, %c0_i32_0 : i32, i32, i32
  }
  func.func @transform_5(%arg0: i32) -> (i32, i32, i32) {
    %c0_i32 = arith.constant 0 : i32
    %c0_i32_0 = arith.constant 0 : i32
    %c0_i32_1 = arith.constant 0 : i32
    return %arg0, %c0_i32, %c0_i32_0 : i32, i32, i32
  }
}

module attributes {stable_mosaic.version = 11 : i64} {
  func.func @_bn_add_relu_kernel(%arg0: i32, %arg1: memref<1x16x128xbf16, #tpu.memory_space<vmem>>, %arg2: memref<1x128xf32, #tpu.memory_space<vmem>>, %arg3: memref<1x128xf32, #tpu.memory_space<vmem>>, %arg4: memref<1x16x128xf32, #tpu.memory_space<vmem>>, %arg5: memref<1x16x128xf32, #tpu.memory_space<vmem>>) attributes {dimension_semantics = [#tpu.dimension_semantics<parallel>], iteration_bounds = array<i64: 2>, scalar_prefetch = 0 : i64, scratch_operands = 0 : i64, tpu.core_type = #tpu.core_type<tc>, window_params = [{transform_indices = @transform_0, window_bounds = array<i64: 1, 16, 128>}, {pipeline_mode = #tpu.pipeline_mode<synchronous>, transform_indices = @transform_1, window_bounds = array<i64: 1, 128>}, {pipeline_mode = #tpu.pipeline_mode<synchronous>, transform_indices = @transform_2, window_bounds = array<i64: 1, 128>}, {transform_indices = @transform_3, window_bounds = array<i64: 1, 16, 128>}, {transform_indices = @transform_4, window_bounds = array<i64: 1, 16, 128>}]} {
    %c0 = arith.constant 0 : index
    %c0_0 = arith.constant 0 : index
    %0 = vector.load %arg2[%c0, %c0_0] : memref<1x128xf32, #tpu.memory_space<vmem>>, vector<1x128xf32>
    %1 = vector.shape_cast %0 : vector<1x128xf32> to vector<1x1x128xf32>
    %c0_1 = arith.constant 0 : index
    %c0_2 = arith.constant 0 : index
    %2 = vector.load %arg3[%c0_1, %c0_2] : memref<1x128xf32, #tpu.memory_space<vmem>>, vector<1x128xf32>
    %3 = vector.shape_cast %2 : vector<1x128xf32> to vector<1x1x128xf32>
    %c0_3 = arith.constant 0 : index
    %c0_4 = arith.constant 0 : index
    %c0_5 = arith.constant 0 : index
    %4 = vector.load %arg1[%c0_3, %c0_4, %c0_5] : memref<1x16x128xbf16, #tpu.memory_space<vmem>>, vector<1x16x128xbf16>
    %5 = arith.extf %4 : vector<1x16x128xbf16> to vector<1x16x128xf32>
    %6 = vector.broadcast %1 : vector<1x1x128xf32> to vector<1x16x128xf32>
    %7 = arith.mulf %5, %6 : vector<1x16x128xf32>
    %8 = vector.broadcast %3 : vector<1x1x128xf32> to vector<1x16x128xf32>
    %9 = arith.addf %7, %8 : vector<1x16x128xf32>
    %c0_6 = arith.constant 0 : index
    %c0_7 = arith.constant 0 : index
    %c0_8 = arith.constant 0 : index
    %10 = vector.load %arg4[%c0_6, %c0_7, %c0_8] : memref<1x16x128xf32, #tpu.memory_space<vmem>>, vector<1x16x128xf32>
    %11 = arith.addf %9, %10 : vector<1x16x128xf32>
    %cst = arith.constant 0.000000e+00 : f32
    %12 = vector.broadcast %cst : f32 to vector<1x16x128xf32>
    %13 = arith.maximumf %11, %12 : vector<1x16x128xf32>
    %c0_9 = arith.constant 0 : index
    %c0_10 = arith.constant 0 : index
    %c0_11 = arith.constant 0 : index
    %14 = vector.load %arg5[%c0_9, %c0_10, %c0_11] : memref<1x16x128xf32, #tpu.memory_space<vmem>>, vector<1x16x128xf32>
    tpu.vector_store %arg5[%c0_9, %c0_10, %c0_11], %13 {strides = array<i32>} : memref<1x16x128xf32, #tpu.memory_space<vmem>>, vector<1x16x128xf32>,
    return
  }
  func.func @transform_0(%arg0: i32) -> (i32, i32, i32) {
    %c0_i32 = arith.constant 0 : i32
    %c0_i32_0 = arith.constant 0 : i32
    %c0_i32_1 = arith.constant 0 : i32
    return %arg0, %c0_i32, %c0_i32_0 : i32, i32, i32
  }
  func.func @transform_1(%arg0: i32) -> (i32, i32) {
    %c0_i32 = arith.constant 0 : i32
    %c0_i32_0 = arith.constant 0 : i32
    %c0_i32_1 = arith.constant 0 : i32
    return %c0_i32, %c0_i32_0 : i32, i32
  }
  func.func @transform_2(%arg0: i32) -> (i32, i32) {
    %c0_i32 = arith.constant 0 : i32
    %c0_i32_0 = arith.constant 0 : i32
    %c0_i32_1 = arith.constant 0 : i32
    return %c0_i32, %c0_i32_0 : i32, i32
  }
  func.func @transform_3(%arg0: i32) -> (i32, i32, i32) {
    %c0_i32 = arith.constant 0 : i32
    %c0_i32_0 = arith.constant 0 : i32
    %c0_i32_1 = arith.constant 0 : i32
    return %arg0, %c0_i32, %c0_i32_0 : i32, i32, i32
  }
  func.func @transform_4(%arg0: i32) -> (i32, i32, i32) {
    %c0_i32 = arith.constant 0 : i32
    %c0_i32_0 = arith.constant 0 : i32
    %c0_i32_1 = arith.constant 0 : i32
    return %arg0, %c0_i32, %c0_i32_0 : i32, i32, i32
  }
}

</mosaic_0001>

<bundles_post_ra>
// kernel: block_forward.3
= control target key start
LH: loop header
LB: loop body
LE: loop exit
PB: predicated region body
PF: predicated region fallthrough
CT: control target
= control target key end

     0   :  { %s877_s12 = smov 0   ;;  %s1014_s0 = inlined_call_operand.vmem [shape: f32[2,16,128], index: 0, kind: input, shape index: {}]   ;;  %s1015_s1 = inlined_call_operand.vmem [shape: bf16[3,128,128], index: 1, kind: input, shape index: {}]   ;;  %s1016_s2 = inlined_call_operand.vmem [shape: bf16[2,16,128], index: 2, kind: output, shape index: {0}]   ;;  %s1017_s3 = inlined_call_operand.vmem [shape: f32[2,2,128], index: 3, kind: output, shape index: {1}]  }
   0x1 LB: > { %s641_s13 = sadd.s32 4294967295, %s853_s12   ;;  %p645_p0 = scmp.ge.s32.totalorder %s853_s12, 1  ;;  %s853_s12 = sphi %s877_s12, %s14_s12  }
   0x2   : > { %p140_p1 = scmp.lt.s32.totalorder %s853_s12, 3 }
   0x4   : > { %p141_p2 = pnand %p645_p0, %p140_p1 }
   0x5   : > { %v823_v0 = vld [vmem:[%s1015_s1] sm:$0xff] (!%p141_p2)   ;;  %v855_v1 = vmov (!%p141_p2), 0.0   ;;  %v824_v2 = vld [vmem:[%s1015_s1 + $0x8] sm:$0xff] (!%p141_p2)   ;;  %vm856_vm0 = vmmov (!%p141_p2), 0   ;;  %p168_p3 = scmp.lt.s32.totalorder (!%p141_p2), %s641_s13, 1  ;;  %v825_v3 = vld [vmem:[%s1015_s1 + $0x10] sm:$0xff] (!%p141_p2)  }
   0x6   : > { %144 = sbr.rel (%p141_p2) target bundleno = 304 (0x130), region = 28  ;;  %767 = vmatprep.subr.bf16.mxu0 (!%p141_p2), %v855_v1  ;;  %747 = vmatprep.subr.bf16.mxu1 (!%p141_p2), %v855_v1  ;;  %v831_v4 = vld [vmem:[%s1015_s1 + $0x40] sm:$0xff] (!%p141_p2)   ;;  %v826_v5 = vld [vmem:[%s1015_s1 + $0x18] sm:$0xff] (!%p141_p2)   ;;  %v833_v8 = vld [vmem:[%s1015_s1 + $0x48] sm:$0xff] (!%p141_p2)   ;;  %vm195_vm1 = vcmask (!%p141_p2), 1040384   ;;  %vm430_vm4 = vcmask (!%p141_p2), 1046528  }
   0x7   : > { %768 = vmatpush3.bf16.msra.mxu0 (!%p141_p2), %v823_v0  ;;  %783 = vmatprep.mubr.msk.bf16.mxu0 (!%p141_p2), %vm856_vm0, %v855_v1  ;;  %v827_v9 = vld [vmem:[%s1015_s1 + $0x20] sm:$0xff] (!%p141_p2)   ;;  %v835_v11 = vld [vmem:[%s1015_s1 + $0x50] sm:$0xff] (!%p141_p2)   ;;  %v828_v12 = vld [vmem:[%s1015_s1 + $0x28] sm:$0xff] (!%p141_p2)   ;;  %vm196_vm2 = vsmask.f32 (!%p141_p2), 256 }
   0x8   : > { %769 = vmatprep.subr.bf16.mxu0 (!%p141_p2), %v855_v1  ;;  %763 = vmatprep.mubr.msk.bf16.mxu1 (!%p141_p2), %vm856_vm0, %v855_v1  ;;  %v837_v14 = vld [vmem:[%s1015_s1 + $0x58] sm:$0xff] (!%p141_p2)   ;;  %v829_v15 = vld [vmem:[%s1015_s1 + $0x30] sm:$0xff] (!%p141_p2)   ;;  %v839_v18 = vld [vmem:[%s1015_s1 + $0x60] sm:$0xff] (!%p141_p2)  }
   0x9   : > { %748 = vmatpush3.bf16.msra.mxu1 (!%p141_p2), %v831_v4  ;;  %v830_v19 = vld [vmem:[%s1015_s1 + $0x38] sm:$0xff] (!%p141_p2)   ;;  %v841_v21 = vld [vmem:[%s1015_s1 + $0x68] sm:$0xff] (!%p141_p2)   ;;  %vm951_vm3 = vmand (!%p141_p2), %vm195_vm1, %vm196_vm2 }
   0xa   : > { %749 = vmatprep.subr.bf16.mxu1 (!%p141_p2), %v855_v1  ;;  %v832_v24 = vld [vmem:[%s1015_s1 + $0x80] sm:$0xff] (!%p141_p2)   ;;  %v843_v25 = vld [vmem:[%s1015_s1 + $0x70] sm:$0xff] (!%p141_p2)   ;;  %v834_v26 = vld [vmem:[%s1015_s1 + $0x88] sm:$0xff] (!%p141_p2)  }
   0xb   : > { %770 = vmatpush3.bf16.msra.mxu0 (!%p141_p2), %v824_v2  ;;  %v845_v27 = vld [vmem:[%s1015_s1 + $0x78] sm:$0xff] (!%p141_p2)   ;;  %v836_v28 = vld [vmem:[%s1015_s1 + $0x90] sm:$0xff] (!%p141_p2)   ;;  %v840_v30 = vld [vmem:[%s1015_s1 + $0xa0] sm:$0xff] (!%p141_p2)  }
   0xc   : > { %771 = vmatprep.subr.bf16.mxu0 (!%p141_p2), %v855_v1  ;;  %v838_v29 = vld [vmem:[%s1015_s1 + $0x98] sm:$0xff] (!%p141_p2)   ;;  %v842_v31 = vld [vmem:[%s1015_s1 + $0xa8] sm:$0xff] (!%p141_p2)   ;;  %v844_v32 = vld [vmem:[%s1015_s1 + $0xb0] sm:$0xff] (!%p141_p2)  }
   0xd   : > { %s1021_s13 = smov (!%p168_p3, %s641_s13), 1  ;;  %750 = vmatpush3.bf16.msra.mxu1 %v833_v8  ;;  %v846_v36 = vld [vmem:[%s1015_s1 + $0xb8] sm:$0xff]  }
   0xe   : > { %s711_s20 = sshll.u32 %s1021_s13, 4  ;;  %751 = vmatprep.subr.bf16.mxu1 %v855_v1  ;;  %s712_s16 = sshll.u32 %s1021_s13, 3 }
   0xf   : > { %s172_s23 = scalar_lea.vmem %s1014_s0, %s711_s20  ;;  %772 = vmatpush3.bf16.msra.mxu0 %v825_v3  ;;  %s177_s19 = scalar_lea.vmem %s1016_s2, %s712_s16 }
  0x10   : > { %v183_v6 = vld [vmem:[%s172_s23] sm:$0xff]  ;;  %v184_v7 = vld [vmem:[%s172_s23 + $0x8] sm:$0xff]  ;;  %773 = vmatprep.subr.bf16.mxu0 %v855_v1  ;;  %s650_s20 = sshll.u32 %s1021_s13, 1 }
  0x11   : > { %v185_v10 = vpack.c.bf16 %v184_v7, %v183_v6  ;;  %752 = vmatpush3.bf16.msra.mxu1 %v835_v11  ;;  %s181_s23 = scalar_lea.vmem %s1017_s3, %s650_s20 }
  0x12   : > { %753 = vmatprep.subr.bf16.mxu1 %v855_v1 }
  0x13   : > { %774 = vmatpush3.bf16.msra.mxu0 %v826_v5  ;;  %v187_v13 = vshrl.u32 %v185_v10, 16  ;;  %v190_v16 = vshll.u32 %v185_v10, 16 }
  0x14   : > { %775 = vmatprep.subr.bf16.mxu0 %v855_v1 }
  0x15   : > { %v189_v17 = vrot.slane %v187_v13, 7  ;;  %754 = vmatpush3.bf16.msra.mxu1 %v837_v14 }
  0x16   : > { %755 = vmatprep.subr.bf16.mxu1 %v855_v1 }
  0x17   : > { %776 = vmatpush3.bf16.msra.mxu0 %v827_v9  ;;  %v192_v20 = vor.u32 %v190_v16, %v189_v17  ;;  %v199_v33 = vsel %vm951_vm3, %v189_v17, 0 }
  0x18   : > { %777 = vmatprep.subr.bf16.mxu0 %v855_v1  ;;  %v432_v35 = vrot.slane %v199_v33, 1 }
  0x19   : > { %756 = vmatpush3.bf16.msra.mxu1 %v839_v18  ;;  %v198_v23 = vsel %vm951_vm3, 0, %v192_v20 }
  0x1a   : > { %757 = vmatprep.subr.bf16.mxu1 %v855_v1  ;;  %v431_v34 = vrot.slane %v198_v23, 1 }
  0x1b   : > { %778 = vmatpush3.bf16.msra.mxu0 %v828_v12 }
  0x1c   : > { %779 = vmatprep.subr.bf16.mxu0 %v855_v1  ;;  %v433_v37 = vsel %vm430_vm4, %v431_v34, %v432_v35 }
  0x1d   : > { %758 = vmatpush3.bf16.msra.mxu1 %v841_v21 }
  0x1e   : > { %759 = vmatprep.subr.bf16.mxu1 %v855_v1 }
  0x1f   : > { %780 = vmatpush3.bf16.msra.mxu0 %v829_v15 }
  0x20   : > { %781 = vmatprep.subr.bf16.mxu0 %v855_v1 }
  0x21   : > { %760 = vmatpush3.bf16.msra.mxu1 %v843_v25 }
  0x22   : > { %761 = vmatprep.subr.bf16.mxu1 %v855_v1 }
  0x23   : > { %782 = vmatpush3.bf16.msra.mxu0 %v830_v19 }
  0x24   : > { %787 = vmatprep.subr.bf16.mxu0 %v855_v1 }
  0x25   : > { %762 = vmatpush3.bf16.msra.mxu1 %v845_v27 }
  0x26   : > { %784 = vmatmul.mubr.bf16.vlgmr.msra.gmra.mrb[0].mxu0 %v198_v23 }
  0x27   : > { %788 = vmatpush3.bf16.msra.mxu0 %v832_v24  ;;  %803 = vmatprep.mubr.msk.bf16.mxu0 %vm856_vm0, %v855_v1 }
  0x28   : > { %789 = vmatprep.subr.bf16.mxu0 %v855_v1  ;;  %764 = vmatmul.mubr.bf16.vlgmr.msra.gmra.mrb[0].mxu1 %v185_v10 }
  0x2b   : > { %790 = vmatpush3.bf16.msra.mxu0 %v834_v26 }
  0x2c   : > { %791 = vmatprep.subr.bf16.mxu0 %v855_v1 }
  0x2f   : > { %792 = vmatpush3.bf16.msra.mxu0 %v836_v28 }
  0x30   : > { %793 = vmatprep.subr.bf16.mxu0 %v855_v1 }
  0x33   : > { %794 = vmatpush3.bf16.msra.mxu0 %v838_v29 }
  0x34   : > { %795 = vmatprep.subr.bf16.mxu0 %v855_v1 }
  0x37   : > { %796 = vmatpush3.bf16.msra.mxu0 %v840_v30 }
  0x38   : > { %797 = vmatprep.subr.bf16.mxu0 %v855_v1 }
  0x3b   : > { %798 = vmatpush3.bf16.msra.mxu0 %v842_v31 }
  0x3c   : > { %799 = vmatprep.subr.bf16.mxu0 %v855_v1 }
  0x3f   : > { %800 = vmatpush3.bf16.msra.mxu0 %v844_v32 }
  0x40   : > { %801 = vmatprep.subr.bf16.mxu0 %v855_v1 }
  0x43   : > { %802 = vmatpush3.bf16.msra.mxu0 %v846_v36 }
  0x46   : > { %804 = vmatmul.mubr.bf16.vlgmr.msra.gmra.mrb[0].mxu0 %v433_v37 }
  0xfb   : > { %v315_v38 = vpop.f32.mrb[0].mxu1 }
  0xfc   : > { %v765_v39 = vpop.f32.mrb[1].mxu1 }
  0xfd   : > { %v318_v40 = vpop.f32.mrb[2].mxu1 }
  0xfe   : > { %v766_v41 = vpop.f32.mrb[3].mxu1 }
 0x119   : > { %v517_v42 = vpop.f32.mrb[0].mxu0 }
 0x11a   : > { %v807_v43 = vadd.f32 %v517_v42, %v315_v38  ;;  %v805_v44 = vpop.f32.mrb[1].mxu0 }
 0x11b   : > { %v520_v45 = vpop.f32.mrb[2].mxu0 }
 0x11c   : > { %v808_v46 = vadd.f32 %v520_v45, %v318_v40  ;;  %v806_v47 = vpop.f32.mrb[3].mxu0  ;;  %v543_v48 = vmul.f32 %v807_v43, %v807_v43 }
 0x11e   : > { %v718_v49 = vpack.c.bf16 %v808_v46, %v807_v43  ;;  %v536_v50 = vadd.f32 %v808_v46, %v807_v43  ;;  %v544_v51 = vmul.f32 %v808_v46, %v808_v46 }
 0x120   : > { %719 = vst [vmem:[%s177_s19] sm:$0xff] %v718_v49   ;;  %v537_v52 = vrot.slane %v536_v50, 4  ;;  %v545_v53 = vadd.f32 %v544_v51, %v543_v48 }
 0x122   : > { %v538_v54 = vadd.f32 %v537_v52, %v536_v50  ;;  %v546_v55 = vrot.slane %v545_v53, 4 }
 0x124   : > { %v539_v56 = vrot.slane %v538_v54, 2  ;;  %v547_v57 = vadd.f32 %v546_v55, %v545_v53 }
 0x126   : > { %v540_v58 = vadd.f32 %v539_v56, %v538_v54  ;;  %v548_v59 = vrot.slane %v547_v57, 2 }
 0x128   : > { %v541_v60 = vrot.slane %v540_v58, 1  ;;  %v549_v61 = vadd.f32 %v548_v59, %v547_v57 }
 0x12a   : > { %v550_v62 = vrot.slane %v549_v61, 1  ;;  %v542_v63 = vadd.f32 %v541_v60, %v540_v58 }
 0x12c   : > { %v551_v0 = vadd.f32 %v550_v62, %v549_v61 }
 0x12e   : > { %v553_v1 = vsel %vm195_vm1, %v542_v63, %v551_v0 }
 0x12f   : > { %554 = vst [vmem:[%s181_s23] sm:$0x3] %v553_v1 }
 0x130 PF: > { %s14_s12 = sadd.s32 1, %s853_s12  }
 0x131   : > { %p11_p4 = scmp.ge.s32.totalorder %s14_s12, 4  }
 0x133   :  { %13 = sbr.rel (!%p11_p4) target bundleno = 1 (0x1), region = 72 }

// kernel: tile.23
= control target key start
LH: loop header
LB: loop body
LE: loop exit
PB: predicated region body
PF: predicated region fallthrough
CT: control target
= control target key end

     0   :  { %s28_s0 = inlined_call_operand.vmem [shape: f32[8], index: 0, kind: input, shape index: {}]   ;;  %s29_s1 = inlined_call_operand.vmem [shape: f32[16,8], index: 1, kind: output, shape index: {}]  }
   0x1   :  { %v4_v0 = vld [vmem:[%s28_s0] ss:$0 sm:$0xff] }
   0x2   :  { %5 = vst [vmem:[%s29_s1] sm:$0xff] %v4_v0  ;;  %8 = vst [vmem:[%s29_s1 + $0x8] sm:$0xff] %v4_v0 }

// kernel: tile.24
= control target key start
LH: loop header
LB: loop body
LE: loop exit
PB: predicated region body
PF: predicated region fallthrough
CT: control target
= control target key end

     0   :  { %s131_s10 = smov 120   ;;  %s132_s11 = smov 104   ;;  %vm3_vm0 = vcmask 64512   ;;  %vm9_vm1 = vcmask 1048512   ;;  %vm15_vm2 = vcmask 982912   ;;  %vm21_vm3 = vcmask 917312   ;;  %s207_s0 = inlined_call_operand.vmem [shape: f32[16,8], index: 0, kind: input, shape index: {}]   ;;  %s208_s1 = inlined_call_operand.vmem [shape: f32[1,128], index: 1, kind: output, shape index: {}]  }
   0x1   :  { %v101_v0 = vld [vmem:[%s207_s0 + $0xf] sm:$0x1]   ;;  %v103_v1 = vld [vmem:[%s207_s0 + $0xd] sm:$0x1]   ;;  %v102_v2 = vld [vmem:[%s207_s0 + $0xe] sm:$0x1]  }
   0x2   :  { %7 = vrot.lane.b32.xlu0 %v101_v0, %s131_s10  ;;  %19 = vrot.lane.b32.xlu1 %v103_v1, %s132_s11  ;;  %v104_v3 = vld [vmem:[%s207_s0 + $0xc] sm:$0x1]   ;;  %s133_s16 = smov 112   ;;  %s134_s17 = smov 96   ;;  %v105_v4 = vld [vmem:[%s207_s0 + $0xb] sm:$0x1]  }
   0x3   :  { %v106_v5 = vld [vmem:[%s207_s0 + $0xa] sm:$0x1]   ;;  %v2_v6 = vld [vmem:[%s207_s0] sm:$0x1]   ;;  %s135_s24 = smov 88   ;;  %s136_s25 = smov 80  }
   0x4   :  { %4 = vst.msk [vmem:[#allocation0] sm:$0x1] %vm3_vm0, %v2_v6   ;;  %v107_v7 = vld [vmem:[%s207_s0 + $0x9] sm:$0x1]   ;;  %v108_v8 = vld [vmem:[%s207_s0 + $0x8] sm:$0x1]  }
   0x5   :  { %s137_s30 = smov 72   ;;  %s138_s2 = smov 64   ;;  %v109_v9 = vld [vmem:[%s207_s0 + $0x7] sm:$0x1]   ;;  %v110_v10 = vld [vmem:[%s207_s0 + $0x6] sm:$0x1]  }
   0x6   :  { %13 = vrot.lane.b32.xlu0 %v102_v2, %s133_s16  ;;  %25 = vrot.lane.b32.xlu1 %v104_v3, %s134_s17  ;;  %s139_s7 = smov 56   ;;  %s140_s8 = smov 48   ;;  %v111_v11 = vld [vmem:[%s207_s0 + $0x5] sm:$0x1]   ;;  %v112_v12 = vld [vmem:[%s207_s0 + $0x4] sm:$0x1]  }
   0x7   :  { %s141_s13 = smov 40   ;;  %s142_s14 = smov 32   ;;  %v113_v13 = vld [vmem:[%s207_s0 + $0x3] sm:$0x1]   ;;  %v114_v14 = vld [vmem:[%s207_s0 + $0x2] sm:$0x1]  }
   0x8   :  { %s143_s19 = smov 24   ;;  %s144_s20 = smov 16   ;;  %v115_v15 = vld [vmem:[%s207_s0 + $0x1] sm:$0x1]   ;;  %vm27_vm4 = vcmask 851712   ;;  %vm33_vm5 = vcmask 786112  }
   0x9   :  { %s145_s0 = smov 8   ;;  %vm39_vm6 = vcmask 720512   ;;  %vm45_vm7 = vcmask 654912   ;;  %vm51_vm8 = vcmask 589312   ;;  %vm57_vm9 = vcmask 523712  }
   0xa   :  { %31 = vrot.lane.b32.xlu0 %v105_v4, %s135_s24  ;;  %37 = vrot.lane.b32.xlu1 %v106_v5, %s136_s25  ;;  %vm63_vm10 = vcmask 458112   ;;  %vm69_vm11 = vcmask 392512   ;;  %vm75_vm12 = vcmask 326912   ;;  %vm81_vm13 = vcmask 261312  }
   0xb   :  { %vm87_vm14 = vcmask 195712   ;;  %vm93_vm15 = vcmask 130112  }
   0xe   :  { %43 = vrot.lane.b32.xlu0 %v107_v7, %s137_s30  ;;  %49 = vrot.lane.b32.xlu1 %v108_v8, %s138_s2 }
  0x12   :  { %55 = vrot.lane.b32.xlu0 %v109_v9, %s139_s7  ;;  %61 = vrot.lane.b32.xlu1 %v110_v10, %s140_s8 }
  0x16   :  { %67 = vrot.lane.b32.xlu0 %v111_v11, %s141_s13  ;;  %73 = vrot.lane.b32.xlu1 %v112_v12, %s142_s14 }
  0x1a   :  { %79 = vrot.lane.b32.xlu0 %v113_v13, %s143_s19  ;;  %85 = vrot.lane.b32.xlu1 %v114_v14, %s144_s20 }
  0x1e   :  { %91 = vrot.lane.b32.xlu0 %v115_v15, %s145_s0 }
  0x74   :  { %v8_v16 = vpop.permute.xlu0 %7   ;;  %v20_v17 = vpop.permute.xlu1 %19  }
  0x75   :  { %10 = vst.msk [vmem:[#allocation0] sm:$0x1] %vm9_vm1, %v8_v16  }
  0x78   :  { %v14_v18 = vpop.permute.xlu0 %13   ;;  %v26_v19 = vpop.permute.xlu1 %25  }
  0x79   :  { %16 = vst.msk [vmem:[#allocation0] sm:$0x1] %vm15_vm2, %v14_v18  }
  0x7a   :  { %22 = vst.msk [vmem:[#allocation0] sm:$0x1] %vm21_vm3, %v20_v17  }
  0x7b   :  { %28 = vst.msk [vmem:[#allocation0] sm:$0x1] %vm27_vm4, %v26_v19  }
  0x7c   :  { %v32_v20 = vpop.permute.xlu0 %31   ;;  %v38_v21 = vpop.permute.xlu1 %37  }
  0x7d   :  { %34 = vst.msk [vmem:[#allocation0] sm:$0x1] %vm33_vm5, %v32_v20  }
  0x7e   :  { %40 = vst.msk [vmem:[#allocation0] sm:$0x1] %vm39_vm6, %v38_v21  }
  0x80   :  { %v44_v22 = vpop.permute.xlu0 %43   ;;  %v50_v23 = vpop.permute.xlu1 %49  }
  0x81   :  { %46 = vst.msk [vmem:[#allocation0] sm:$0x1] %vm45_vm7, %v44_v22  }
  0x82   :  { %52 = vst.msk [vmem:[#allocation0] sm:$0x1] %vm51_vm8, %v50_v23  }
  0x84   :  { %v56_v24 = vpop.permute.xlu0 %55   ;;  %v62_v25 = vpop.permute.xlu1 %61  }
  0x85   :  { %58 = vst.msk [vmem:[#allocation0] sm:$0x1] %vm57_vm9, %v56_v24  }
  0x86   :  { %64 = vst.msk [vmem:[#allocation0] sm:$0x1] %vm63_vm10, %v62_v25  }
  0x88   :  { %v68_v26 = vpop.permute.xlu0 %67   ;;  %v74_v27 = vpop.permute.xlu1 %73  }
  0x89   :  { %70 = vst.msk [vmem:[#allocation0] sm:$0x1] %vm69_vm11, %v68_v26  }
  0x8a   :  { %76 = vst.msk [vmem:[#allocation0] sm:$0x1] %vm75_vm12, %v74_v27  }
  0x8c   :  { %v80_v28 = vpop.permute.xlu0 %79   ;;  %v86_v29 = vpop.permute.xlu1 %85  }
  0x8d   :  { %82 = vst.msk [vmem:[#allocation0] sm:$0x1] %vm81_vm13, %v80_v28  }
  0x8e   :  { %88 = vst.msk [vmem:[#allocation0] sm:$0x1] %vm87_vm14, %v86_v29  }
  0x90   :  { %v92_v30 = vpop.permute.xlu0 %91  }
  0x91   :  { %94 = vst.msk [vmem:[#allocation0] sm:$0x1] %vm93_vm15, %v92_v30  }
  0x98   :  { %v98_v31 = vld [vmem:[#allocation0] sm:$0x1] }
  0x99   :  { %100 = vst [vmem:[%s208_s1] sm:$0x1] %v98_v31 }

// kernel: block_forward.4
= control target key start
LH: loop header
LB: loop body
LE: loop exit
PB: predicated region body
PF: predicated region fallthrough
CT: control target
= control target key end

     0   :  { %s969_s18 = smov 0   ;;  %s1115_s0 = inlined_call_operand.vmem [shape: bf16[2,16,128], index: 0, kind: input, shape index: {}]   ;;  %s1116_s1 = inlined_call_operand.vmem [shape: f32[1,128], index: 1, kind: input, shape index: {}]   ;;  %s1117_s2 = inlined_call_operand.vmem [shape: f32[1,128], index: 2, kind: input, shape index: {}]   ;;  %s1118_s3 = inlined_call_operand.vmem [shape: bf16[3,128,128], index: 3, kind: input, shape index: {}]   ;;  %s1119_s4 = inlined_call_operand.vmem [shape: bf16[2,16,128], index: 4, kind: output, shape index: {0}]   ;;  %s1120_s5 = inlined_call_operand.vmem [shape: f32[2,2,128], index: 5, kind: output, shape index: {1}]  }
   0x1 LB: > { %s717_s19 = sadd.s32 4294967295, %s935_s18   ;;  %p721_p0 = scmp.ge.s32.totalorder %s935_s18, 1  ;;  %s935_s18 = sphi %s969_s18, %s16_s18  }
   0x2   : > { %p190_p1 = scmp.lt.s32.totalorder %s935_s18, 3 }
   0x4   : > { %p191_p2 = pnand %p721_p0, %p190_p1 }
   0x5   : > { %v905_v0 = vld [vmem:[%s1118_s3] sm:$0xff] (!%p191_p2)   ;;  %v937_v1 = vmov (!%p191_p2), 0.0   ;;  %v906_v2 = vld [vmem:[%s1118_s3 + $0x8] sm:$0xff] (!%p191_p2)   ;;  %vm938_vm0 = vmmov (!%p191_p2), 0   ;;  %p222_p3 = scmp.lt.s32.totalorder (!%p191_p2), %s717_s19, 1  ;;  %v907_v3 = vld [vmem:[%s1118_s3 + $0x10] sm:$0xff] (!%p191_p2)  }
   0x6   : > { %194 = sbr.rel (%p191_p2) target bundleno = 304 (0x130), region = 36  ;;  %849 = vmatprep.subr.bf16.mxu0 (!%p191_p2), %v937_v1  ;;  %829 = vmatprep.subr.bf16.mxu1 (!%p191_p2), %v937_v1  ;;  %v913_v4 = vld [vmem:[%s1118_s3 + $0x40] sm:$0xff] (!%p191_p2)   ;;  %v908_v7 = vld [vmem:[%s1118_s3 + $0x18] sm:$0xff] (!%p191_p2)   ;;  %v915_v13 = vld [vmem:[%s1118_s3 + $0x48] sm:$0xff] (!%p191_p2)   ;;  %vm271_vm1 = vcmask (!%p191_p2), 1040384   ;;  %vm506_vm4 = vcmask (!%p191_p2), 1046528  }
   0x7   : > { %850 = vmatpush3.bf16.msra.mxu0 (!%p191_p2), %v905_v0  ;;  %865 = vmatprep.mubr.msk.bf16.mxu0 (!%p191_p2), %vm938_vm0, %v937_v1  ;;  %v727_v5 = vld [vmem:[%s1116_s1] ss:$0 sm:$0xff] (!%p191_p2)  ;;  %v917_v17 = vld [vmem:[%s1118_s3 + $0x50] sm:$0xff] (!%p191_p2)   ;;  %v910_v18 = vld [vmem:[%s1118_s3 + $0x28] sm:$0xff] (!%p191_p2)   ;;  %vm272_vm2 = vsmask.f32 (!%p191_p2), 256 }
   0x8   : > { %851 = vmatprep.subr.bf16.mxu0 (!%p191_p2), %v937_v1  ;;  %845 = vmatprep.mubr.msk.bf16.mxu1 (!%p191_p2), %vm938_vm0, %v937_v1  ;;  %v728_v10 = vld [vmem:[%s1117_s2] ss:$0 sm:$0xff] (!%p191_p2)  ;;  %v919_v22 = vld [vmem:[%s1118_s3 + $0x58] sm:$0xff] (!%p191_p2)   ;;  %v911_v23 = vld [vmem:[%s1118_s3 + $0x30] sm:$0xff] (!%p191_p2)  }
   0x9   : > { %830 = vmatpush3.bf16.msra.mxu1 (!%p191_p2), %v913_v4  ;;  %v909_v14 = vld [vmem:[%s1118_s3 + $0x20] sm:$0xff] (!%p191_p2)   ;;  %v912_v28 = vld [vmem:[%s1118_s3 + $0x38] sm:$0xff] (!%p191_p2)   ;;  %v923_v30 = vld [vmem:[%s1118_s3 + $0x68] sm:$0xff] (!%p191_p2)  }
   0xa   : > { %831 = vmatprep.subr.bf16.mxu1 (!%p191_p2), %v937_v1  ;;  %v921_v25 = vld [vmem:[%s1118_s3 + $0x60] sm:$0xff] (!%p191_p2)   ;;  %vm1051_vm3 = vmand (!%p191_p2), %vm271_vm1, %vm272_vm2  ;;  %v925_v34 = vld [vmem:[%s1118_s3 + $0x70] sm:$0xff] (!%p191_p2)  }
   0xb   : > { %852 = vmatpush3.bf16.msra.mxu0 (!%p191_p2), %v906_v2  ;;  %v914_v33 = vld [vmem:[%s1118_s3 + $0x80] sm:$0xff] (!%p191_p2)   ;;  %v916_v35 = vld [vmem:[%s1118_s3 + $0x88] sm:$0xff] (!%p191_p2)   ;;  %v927_v36 = vld [vmem:[%s1118_s3 + $0x78] sm:$0xff] (!%p191_p2)  }
   0xc   : > { %853 = vmatprep.subr.bf16.mxu0 (!%p191_p2), %v937_v1  ;;  %v918_v37 = vld [vmem:[%s1118_s3 + $0x90] sm:$0xff] (!%p191_p2)   ;;  %v920_v38 = vld [vmem:[%s1118_s3 + $0x98] sm:$0xff] (!%p191_p2)   ;;  %v922_v39 = vld [vmem:[%s1118_s3 + $0xa0] sm:$0xff] (!%p191_p2)  }
   0xd   : > { %s1124_s19 = smov (!%p222_p3, %s717_s19), 1  ;;  %832 = vmatpush3.bf16.msra.mxu1 %v915_v13  ;;  %v924_v40 = vld [vmem:[%s1118_s3 + $0xa8] sm:$0xff]   ;;  %v926_v41 = vld [vmem:[%s1118_s3 + $0xb0] sm:$0xff]   ;;  %v928_v45 = vld [vmem:[%s1118_s3 + $0xb8] sm:$0xff]  }
   0xe   : > { %s789_s26 = sshll.u32 %s1124_s19, 3  ;;  %833 = vmatprep.subr.bf16.mxu1 %v937_v1  ;;  %s726_s10 = sshll.u32 %s1124_s19, 1 }
   0xf   : > { %s226_s29 = scalar_lea.vmem %s1115_s0, %s789_s26  ;;  %854 = vmatpush3.bf16.msra.mxu0 %v907_v3  ;;  %s231_s9 = scalar_lea.vmem %s1119_s4, %s789_s26 }
  0x10   : > { %v794_v6 = vld [vmem:[%s226_s29] sm:$0xff]   ;;  %855 = vmatprep.subr.bf16.mxu0 %v937_v1  ;;  %s235_s12 = scalar_lea.vmem %s1120_s5, %s726_s10 }
  0x11   : > { %v795_v8 = vunpack.c.l.bf16 %v794_v6  ;;  %v796_v9 = vunpack.c.h.bf16 %v794_v6  ;;  %834 = vmatpush3.bf16.msra.mxu1 %v917_v17 }
  0x12   : > { %835 = vmatprep.subr.bf16.mxu1 %v937_v1 }
  0x13   : > { %v249_v11 = vmul.f32 %v795_v8, %v727_v5  ;;  %v250_v12 = vmul.f32 %v796_v9, %v727_v5  ;;  %856 = vmatpush3.bf16.msra.mxu0 %v908_v7 }
  0x14   : > { %857 = vmatprep.subr.bf16.mxu0 %v937_v1 }
  0x15   : > { %v257_v15 = vadd.f32 %v728_v10, %v249_v11  ;;  %v258_v16 = vadd.f32 %v728_v10, %v250_v12  ;;  %836 = vmatpush3.bf16.msra.mxu1 %v919_v22 }
  0x16   : > { %837 = vmatprep.subr.bf16.mxu1 %v937_v1 }
  0x17   : > { %v259_v19 = vmax.f32 %v257_v15, 0.0  ;;  %v260_v20 = vmax.f32 %v258_v16, 0.0  ;;  %858 = vmatpush3.bf16.msra.mxu0 %v909_v14 }
  0x18   : > { %859 = vmatprep.subr.bf16.mxu0 %v937_v1 }
  0x19   : > { %v261_v21 = vpack.c.bf16 %v260_v20, %v259_v19  ;;  %838 = vmatpush3.bf16.msra.mxu1 %v921_v25 }
  0x1a   : > { %839 = vmatprep.subr.bf16.mxu1 %v937_v1 }
  0x1b   : > { %v263_v24 = vshrl.u32 %v261_v21, 16  ;;  %860 = vmatpush3.bf16.msra.mxu0 %v910_v18  ;;  %v266_v27 = vshll.u32 %v261_v21, 16 }
  0x1c   : > { %861 = vmatprep.subr.bf16.mxu0 %v937_v1 }
  0x1d   : > { %v265_v26 = vrot.slane %v263_v24, 7  ;;  %840 = vmatpush3.bf16.msra.mxu1 %v923_v30 }
  0x1e   : > { %841 = vmatprep.subr.bf16.mxu1 %v937_v1 }
  0x1f   : > { %862 = vmatpush3.bf16.msra.mxu0 %v911_v23  ;;  %v268_v29 = vor.u32 %v266_v27, %v265_v26  ;;  %v275_v42 = vsel %vm1051_vm3, %v265_v26, 0 }
  0x20   : > { %863 = vmatprep.subr.bf16.mxu0 %v937_v1  ;;  %v508_v44 = vrot.slane %v275_v42, 1 }
  0x21   : > { %v274_v32 = vsel %vm1051_vm3, 0, %v268_v29  ;;  %842 = vmatpush3.bf16.msra.mxu1 %v925_v34 }
  0x22   : > { %843 = vmatprep.subr.bf16.mxu1 %v937_v1  ;;  %v507_v43 = vrot.slane %v274_v32, 1 }
  0x23   : > { %864 = vmatpush3.bf16.msra.mxu0 %v912_v28 }
  0x24   : > { %869 = vmatprep.subr.bf16.mxu0 %v937_v1  ;;  %v509_v46 = vsel %vm506_vm4, %v507_v43, %v508_v44 }
  0x25   : > { %844 = vmatpush3.bf16.msra.mxu1 %v927_v36 }
  0x26   : > { %866 = vmatmul.mubr.bf16.vlgmr.msra.gmra.mrb[0].mxu0 %v274_v32 }
  0x27   : > { %870 = vmatpush3.bf16.msra.mxu0 %v914_v33  ;;  %885 = vmatprep.mubr.msk.bf16.mxu0 %vm938_vm0, %v937_v1 }
  0x28   : > { %871 = vmatprep.subr.bf16.mxu0 %v937_v1  ;;  %846 = vmatmul.mubr.bf16.vlgmr.msra.gmra.mrb[0].mxu1 %v261_v21 }
  0x2b   : > { %872 = vmatpush3.bf16.msra.mxu0 %v916_v35 }
  0x2c   : > { %873 = vmatprep.subr.bf16.mxu0 %v937_v1 }
  0x2f   : > { %874 = vmatpush3.bf16.msra.mxu0 %v918_v37 }
  0x30   : > { %875 = vmatprep.subr.bf16.mxu0 %v937_v1 }
  0x33   : > { %876 = vmatpush3.bf16.msra.mxu0 %v920_v38 }
  0x34   : > { %877 = vmatprep.subr.bf16.mxu0 %v937_v1 }
  0x37   : > { %878 = vmatpush3.bf16.msra.mxu0 %v922_v39 }
  0x38   : > { %879 = vmatprep.subr.bf16.mxu0 %v937_v1 }
  0x3b   : > { %880 = vmatpush3.bf16.msra.mxu0 %v924_v40 }
  0x3c   : > { %881 = vmatprep.subr.bf16.mxu0 %v937_v1 }
  0x3f   : > { %882 = vmatpush3.bf16.msra.mxu0 %v926_v41 }
  0x40   : > { %883 = vmatprep.subr.bf16.mxu0 %v937_v1 }
  0x43   : > { %884 = vmatpush3.bf16.msra.mxu0 %v928_v45 }
  0x46   : > { %886 = vmatmul.mubr.bf16.vlgmr.msra.gmra.mrb[0].mxu0 %v509_v46 }
  0xfb   : > { %v391_v47 = vpop.f32.mrb[0].mxu1 }
  0xfc   : > { %v847_v48 = vpop.f32.mrb[1].mxu1 }
  0xfd   : > { %v394_v49 = vpop.f32.mrb[2].mxu1 }
  0xfe   : > { %v848_v50 = vpop.f32.mrb[3].mxu1 }
 0x119   : > { %v593_v51 = vpop.f32.mrb[0].mxu0 }
 0x11a   : > { %v889_v52 = vadd.f32 %v593_v51, %v391_v47  ;;  %v887_v53 = vpop.f32.mrb[1].mxu0 }
 0x11b   : > { %v596_v54 = vpop.f32.mrb[2].mxu0 }
 0x11c   : > { %v890_v55 = vadd.f32 %v596_v54, %v394_v49  ;;  %v888_v56 = vpop.f32.mrb[3].mxu0  ;;  %v619_v57 = vmul.f32 %v889_v52, %v889_v52 }
 0x11e   : > { %v800_v58 = vpack.c.bf16 %v890_v55, %v889_v52  ;;  %v612_v59 = vadd.f32 %v890_v55, %v889_v52  ;;  %v620_v60 = vmul.f32 %v890_v55, %v890_v55 }
 0x120   : > { %801 = vst [vmem:[%s231_s9] sm:$0xff] %v800_v58   ;;  %v613_v61 = vrot.slane %v612_v59, 4  ;;  %v621_v62 = vadd.f32 %v620_v60, %v619_v57 }
 0x122   : > { %v614_v63 = vadd.f32 %v613_v61, %v612_v59  ;;  %v622_v0 = vrot.slane %v621_v62, 4 }
 0x124   : > { %v615_v1 = vrot.slane %v614_v63, 2  ;;  %v623_v2 = vadd.f32 %v622_v0, %v621_v62 }
 0x126   : > { %v616_v3 = vadd.f32 %v615_v1, %v614_v63  ;;  %v624_v4 = vrot.slane %v623_v2, 2 }
 0x128   : > { %v617_v5 = vrot.slane %v616_v3, 1  ;;  %v625_v6 = vadd.f32 %v624_v4, %v623_v2 }
 0x12a   : > { %v626_v7 = vrot.slane %v625_v6, 1  ;;  %v618_v8 = vadd.f32 %v617_v5, %v616_v3 }
 0x12c   : > { %v627_v9 = vadd.f32 %v626_v7, %v625_v6 }
 0x12e   : > { %v629_v10 = vsel %vm271_vm1, %v618_v8, %v627_v9 }
 0x12f   : > { %630 = vst [vmem:[%s235_s12] sm:$0x3] %v629_v10 }
 0x130 PF: > { %s16_s18 = sadd.s32 1, %s935_s18  }
 0x131   : > { %p13_p4 = scmp.ge.s32.totalorder %s16_s18, 4  }
 0x133   :  { %15 = sbr.rel (!%p13_p4) target bundleno = 1 (0x1), region = 80 }

// kernel: block_forward.5
= control target key start
LH: loop header
LB: loop body
LE: loop exit
PB: predicated region body
PF: predicated region fallthrough
CT: control target
= control target key end

     0   :  { %s378_s15 = smov 0   ;;  %s404_s0 = inlined_call_operand.vmem [shape: bf16[2,16,128], index: 0, kind: input, shape index: {}]   ;;  %s405_s1 = inlined_call_operand.vmem [shape: f32[1,128], index: 1, kind: input, shape index: {}]   ;;  %s406_s2 = inlined_call_operand.vmem [shape: f32[1,128], index: 2, kind: input, shape index: {}]   ;;  %s407_s3 = inlined_call_operand.vmem [shape: f32[2,16,128], index: 3, kind: input, shape index: {}, may-alias: {3,4}]   ;;  %s408_s4 = inlined_call_operand.vmem [shape: f32[2,16,128], index: 4, kind: output, shape index: {}, may-alias: {3,4}]  }
   0x1 LB: > { %s315_s16 = sadd.s32 4294967295, %s351_s15   ;;  %p319_p0 = scmp.ge.s32.totalorder %s351_s15, 1  ;;  %s351_s15 = sphi %s378_s15, %s14_s15  }
   0x2   : > { %p172_p1 = scmp.lt.s32.totalorder %s351_s15, 3 }
   0x4   : > { %p173_p2 = pnand %p319_p0, %p172_p1 }
   0x5   : > { %p203_p3 = scmp.lt.s32.totalorder (!%p173_p2), %s315_s16, 1  ;;  %v326_v0 = vld [vmem:[%s405_s1] ss:$0 sm:$0xff] (!%p173_p2) }
   0x6   : > { %176 = sbr.rel (%p173_p2) target bundleno = 28 (0x1c), region = 36  ;;  %v327_v4 = vld [vmem:[%s406_s2] ss:$0 sm:$0xff] (!%p173_p2) }
   0xd   : > { %s410_s16 = smov (!%p203_p3, %s315_s16), 1 }
   0xe   : > { %s330_s17 = sshll.u32 %s410_s16, 3  ;;  %s331_s18 = sshll.u32 %s410_s16, 4 }
   0xf   : > { %s207_s21 = scalar_lea.vmem %s404_s0, %s330_s17  ;;  %s212_s26 = scalar_lea.vmem %s407_s3, %s331_s18 }
  0x10   : > { %v334_v1 = vld [vmem:[%s207_s21] sm:$0xff]   ;;  %v241_v8 = vld [vmem:[%s212_s26 + $0x8] sm:$0xff]  ;;  %s217_s5 = scalar_lea.vmem %s408_s4, %s331_s18 }
  0x11   : > { %v335_v2 = vunpack.c.l.bf16 %v334_v1  ;;  %v336_v3 = vunpack.c.h.bf16 %v334_v1  ;;  %v240_v7 = vld [vmem:[%s212_s26] sm:$0xff] }
  0x13   : > { %v230_v5 = vmul.f32 %v335_v2, %v326_v0  ;;  %v231_v6 = vmul.f32 %v336_v3, %v326_v0 }
  0x15   : > { %v238_v9 = vadd.f32 %v327_v4, %v230_v5  ;;  %v239_v10 = vadd.f32 %v327_v4, %v231_v6 }
  0x17   : > { %v242_v11 = vadd.f32 %v240_v7, %v238_v9  ;;  %v243_v12 = vadd.f32 %v241_v8, %v239_v10 }
  0x19   : > { %v244_v13 = vmax.f32 %v242_v11, 0.0  ;;  %v245_v14 = vmax.f32 %v243_v12, 0.0 }
  0x1b   : > { %246 = vst [vmem:[%s217_s5] sm:$0xff] %v244_v13  ;;  %247 = vst [vmem:[%s217_s5 + $0x8] sm:$0xff] %v245_v14 }
  0x1c PF: > { %s14_s15 = sadd.s32 1, %s351_s15  }
  0x1d   : > { %p11_p4 = scmp.ge.s32.totalorder %s14_s15, 4  }
  0x1f   :  { %13 = sbr.rel (!%p11_p4) target bundleno = 1 (0x1), region = 69 }

</bundles_post_ra>
